<compile_context>
chip_gen: v7x
topology: tpu7x:2x2x1
jax: 0.10.0
libtpu: 0.0.40
codegen_flags: <defaults>
</compile_context>

<pallas_src>
import jax
import jax.numpy as jnp
from jax.experimental import pallas as pl
from jax.experimental.pallas import tpu as pltpu

LANES = 128            # vreg lane width
TM_MAX = 8192          # rows per tile -> 4 MiB f32 per input tile
ACC_ROWS_MAX = 64      # resident accumulator rows (>= 8 independent vreg chains)
VMEM_LIMIT = 36 << 20  # covers 16 MiB double-buffered inputs on every TPU gen
MAX_CORES = 2          # cap the core-split axis


def _round_up(x: int, m: int) -> int:
    return ((x + m - 1) // m) * m


def _sublane_align(dtype) -> int:
    # sublane tiling requirement per dtype width (f32:8, bf16:16, int8/fp8:32)
    return {4: 8, 2: 16, 1: 32}.get(jnp.dtype(dtype).itemsize, 8)


def _num_tensorcores() -> int:
    """Best-effort TensorCore count; falls back to 1 (always safe/correct)."""
    try:
        info = pltpu.get_tpu_info()
        for name in ("num_cores", "core_count", "num_tensorcores",
                     "tensor_core_count", "num_tensor_cores"):
            v = getattr(info, name, None)
            if v:
                return max(1, int(v))
    except Exception:
        pass
    return 1


def nonlin_mse_loss(net_output: jax.Array, target: jax.Array) -> jax.Array:
    """mean((sigmoid(net_output) - target)**2) over all elements."""
    assert net_output.shape == target.shape, (net_output.shape, target.shape)
    n_elems = int(net_output.size)
    if n_elems == 0:
        return jnp.float32(0.0)

    x_flat = net_output.reshape(-1)
    t_flat = target.reshape(-1)

    # Ragged tail (< 128 elements) handled in plain JAX -> no full-array pad.
    rem = n_elems % LANES
    n_main = n_elems - rem

    tail_sum = jnp.float32(0.0)
    if rem:
        tx = x_flat[n_main:].astype(jnp.float32)
        tt = t_flat[n_main:].astype(jnp.float32)
        td = jax.nn.sigmoid(tx) - tt
        tail_sum = jnp.sum(td * td)

    if n_main == 0:
        # Entire input smaller than one lane row: plain JAX is optimal.
        return (tail_sum / jnp.float32(n_elems)).astype(jnp.float32)

    M = n_main // LANES
    x2d = x_flat[:n_main].reshape(M, LANES)   # pure reshape when rem == 0
    t2d = t_flat[:n_main].reshape(M, LANES)

    # Row tile: multiple of the sublane alignment of BOTH dtypes (bf16-safe).
    row_align = max(_sublane_align(x2d.dtype), _sublane_align(t2d.dtype))
    tm = min(TM_MAX, _round_up(M, row_align))

    # Largest accumulator height (<=64) dividing tm; tm is a multiple of 8.
    acc_rows = next(r for r in (ACC_ROWS_MAX, 32, 16, 8) if tm % r == 0)

    num_blocks = pl.cdiv(M, tm)
    ncores = max(1, min(MAX_CORES, _num_tensorcores(), num_blocks))
    steps = pl.cdiv(num_blocks, ncores)
    # Overhang: partial final block and/or clamped out-of-range blocks.
    # The mask below is tied to exactly this condition (correctness guard).
    needs_mask = (ncores * steps * tm) != M

    def kernel(x_ref, t_ref, o_ref):
        c = pl.program_id(0)
        s = pl.program_id(1)

        @pl.when(s == 0)
        def _():
            o_ref[...] = jnp.zeros_like(o_ref)

        x = x_ref[...].astype(jnp.float32)
        t = t_ref[...].astype(jnp.float32)
        d = jax.nn.sigmoid(x) - t                 # nonlinearity on the EUP path
        sq = d * d

        def fold(v):
            # Sublane-aligned reshape (free) + VPU adds into the resident
            # (acc_rows, 128) block: acc_rows/8 independent vreg add-chains.
            return jnp.sum(v.reshape(tm // acc_rows, acc_rows, LANES), axis=0)

        if needs_mask:
            row0 = (c * steps + s) * tm

            # Interior blocks skip the mask entirely.
            @pl.when(row0 + tm <= M)
            def _():
                o_ref[...] += fold(sq)

            # Only the final partial / clamped out-of-range blocks pay the mask.
            @pl.when(row0 + tm > M)
            def _():
                rows = row0 + jax.lax.broadcasted_iota(jnp.int32, (tm, LANES), 0)
                # NOTE: jnp.where is a *select*, so stale/garbage (even NaN/Inf)
                # data in masked rows of a partial or clamped tile cannot
                # propagate. Do NOT replace with a multiply-by-mask.
                o_ref[...] += fold(jnp.where(rows < M, sq, 0.0))
        else:
            o_ref[...] += fold(sq)

    bytes_in = n_main * (jnp.dtype(x2d.dtype).itemsize
                         + jnp.dtype(t2d.dtype).itemsize)
    cost = pl.CostEstimate(
        flops=4 * n_main,
        transcendentals=n_main,
        bytes_accessed=bytes_in + ncores * acc_rows * LANES * 4,
    )

    partials = pl.pallas_call(
        kernel,
        out_shape=jax.ShapeDtypeStruct((ncores * acc_rows, LANES), jnp.float32),
        grid_spec=pltpu.PrefetchScalarGridSpec(
            num_scalar_prefetch=0,
            grid=(ncores, steps),
            in_specs=[
                pl.BlockSpec((tm, LANES), lambda c, s: (c * steps + s, 0)),
                pl.BlockSpec((tm, LANES), lambda c, s: (c * steps + s, 0)),
            ],
            out_specs=pl.BlockSpec((acc_rows, LANES), lambda c, s: (c, 0)),
        ),
        compiler_params=pltpu.CompilerParams(
            # core-split axis first (parallel), reduction axis last (arbitrary)
            dimension_semantics=("parallel", "arbitrary"),
            # Big tiles (up to 16 MiB double-buffered inputs) exceed v5e's
            # 16 MiB scoped-VMEM default; 36 MiB fits every gen's physical VMEM.
            vmem_limit_bytes=VMEM_LIMIT,
        ),
        cost_estimate=cost,
    )(x2d, t2d)

    # Single cross-lane reduce + mean (scalar glue) in the wrapper.
    total = jnp.sum(partials) + tail_sum
    return (total / jnp.float32(n_elems)).astype(jnp.float32)


def _ref_loss(x, t):
    return jnp.mean((jax.nn.sigmoid(x.astype(jnp.float32))
                     - t.astype(jnp.float32)) ** 2)


if __name__ == "__main__":
    key = jax.random.PRNGKey(0)
    k1, k2, k3, k4 = jax.random.split(key, 4)

    # NCHW logits + regression target in [0, 1], as the PyTorch module receives.
    net_output = jax.random.normal(k1, (2, 4, 16, 16), dtype=jnp.float32)
    target = jax.random.uniform(k2, (2, 4, 16, 16), dtype=jnp.float32)

    loss = nonlin_mse_loss(net_output, target)
    jax.block_until_ready(loss)
    ref = _ref_loss(net_output, target)
    assert jnp.allclose(loss, ref, rtol=1e-5, atol=1e-6), (loss, ref)

    # Unaligned shape: exercises the masked partial block + ragged-tail path.
    x_u = jax.random.normal(k3, (2, 3, 10, 13), dtype=jnp.float32)
    t_u = jax.random.uniform(k4, (2, 3, 10, 13), dtype=jnp.float32)
    loss_u = nonlin_mse_loss(x_u, t_u)
    jax.block_until_ready(loss_u)
    ref_u = _ref_loss(x_u, t_u)
    assert jnp.allclose(loss_u, ref_u, rtol=1e-5, atol=1e-6), (loss_u, ref_u)

    # bf16 passthrough: inputs streamed in bf16, upcast in-register.
    x_b = net_output.astype(jnp.bfloat16)
    t_b = target.astype(jnp.bfloat16)
    loss_b = nonlin_mse_loss(x_b, t_b)
    jax.block_until_ready(loss_b)
    ref_b = _ref_loss(x_b, t_b)
    assert jnp.allclose(loss_b, ref_b, rtol=1e-4, atol=1e-5), (loss_b, ref_b)

    print("KERNEL_OK")
</pallas_src>

<mosaic_0001>
module attributes {stable_mosaic.version = 11 : i64} {
  func.func @kernel(%arg0: i32, %arg1: i32, %arg2: memref<16x128xf32, #tpu.memory_space<vmem>>, %arg3: memref<16x128xf32, #tpu.memory_space<vmem>>, %arg4: memref<16x128xf32, #tpu.memory_space<vmem>>) attributes {dimension_semantics = [#tpu.dimension_semantics<parallel>, #tpu.dimension_semantics<arbitrary>], iteration_bounds = array<i64: 1, 1>, scalar_prefetch = 0 : i64, scratch_operands = 0 : i64, tpu.core_type = #tpu.core_type<tc>, window_params = [{transform_indices = @transform_0, window_bounds = array<i64: 16, 128>}, {transform_indices = @transform_1, window_bounds = array<i64: 16, 128>}, {transform_indices = @transform_2, window_bounds = array<i64: 16, 128>}]} {
    %c0_i32 = arith.constant 0 : i32
    %0 = arith.cmpi eq, %arg1, %c0_i32 : i32
    %1 = arith.extui %0 : i1 to i32
    %c0_i32_0 = arith.constant 0 : i32
    %2 = arith.cmpi ne, %1, %c0_i32_0 : i32
    scf.if %2 {
      %cst_9 = arith.constant 0.000000e+00 : f32
      %17 = vector.broadcast %cst_9 : f32 to vector<16x128xf32>
      %c0_10 = arith.constant 0 : index
      %c0_11 = arith.constant 0 : index
      %18 = vector.load %arg4[%c0_10, %c0_11] : memref<16x128xf32, #tpu.memory_space<vmem>>, vector<16x128xf32>
      tpu.vector_store %arg4[%c0_10, %c0_11], %17 {strides = array<i32>} : memref<16x128xf32, #tpu.memory_space<vmem>>, vector<16x128xf32>,
    } else {
    }
    %c0 = arith.constant 0 : index
    %c0_1 = arith.constant 0 : index
    %3 = vector.load %arg2[%c0, %c0_1] : memref<16x128xf32, #tpu.memory_space<vmem>>, vector<16x128xf32>
    %c0_2 = arith.constant 0 : index
    %c0_3 = arith.constant 0 : index
    %4 = vector.load %arg3[%c0_2, %c0_3] : memref<16x128xf32, #tpu.memory_space<vmem>>, vector<16x128xf32>
    %5 = arith.negf %3 : vector<16x128xf32>
    %6 = math.exp %5 : vector<16x128xf32>
    %cst = arith.constant 1.000000e+00 : f32
    %7 = vector.broadcast %cst : f32 to vector<16x128xf32>
    %8 = arith.addf %7, %6 : vector<16x128xf32>
    %9 = arith.divf %7, %8 : vector<16x128xf32>
    %10 = arith.subf %9, %4 : vector<16x128xf32>
    %11 = arith.mulf %10, %10 : vector<16x128xf32>
    %c0_4 = arith.constant 0 : index
    %c0_5 = arith.constant 0 : index
    %12 = vector.load %arg4[%c0_4, %c0_5] : memref<16x128xf32, #tpu.memory_space<vmem>>, vector<16x128xf32>
    %13 = vector.shape_cast %11 : vector<16x128xf32> to vector<1x16x128xf32>
    %cst_6 = arith.constant dense<0.000000e+00> : vector<16x128xf32>
    %14 = vector.multi_reduction <add>, %13, %cst_6 [0] : vector<1x16x128xf32> to vector<16x128xf32>
    %15 = arith.addf %12, %14 : vector<16x128xf32>
    %c0_7 = arith.constant 0 : index
    %c0_8 = arith.constant 0 : index
    %16 = vector.load %arg4[%c0_7, %c0_8] : memref<16x128xf32, #tpu.memory_space<vmem>>, vector<16x128xf32>
    tpu.vector_store %arg4[%c0_7, %c0_8], %15 {strides = array<i32>} : memref<16x128xf32, #tpu.memory_space<vmem>>, vector<16x128xf32>,
    return
  }
  func.func @transform_0(%arg0: i32, %arg1: i32) -> (i32, i32) {
    %c1_i32 = arith.constant 1 : i32
    %0 = arith.muli %arg0, %c1_i32 : i32
    %1 = arith.addi %0, %arg1 : i32
    %c0_i32 = arith.constant 0 : i32
    %c0_i32_0 = arith.constant 0 : i32
    return %1, %c0_i32 : i32, i32
  }
  func.func @transform_1(%arg0: i32, %arg1: i32) -> (i32, i32) {
    %c1_i32 = arith.constant 1 : i32
    %0 = arith.muli %arg0, %c1_i32 : i32
    %1 = arith.addi %0, %arg1 : i32
    %c0_i32 = arith.constant 0 : i32
    %c0_i32_0 = arith.constant 0 : i32
    return %1, %c0_i32 : i32, i32
  }
  func.func @transform_2(%arg0: i32, %arg1: i32) -> (i32, i32) {
    %c0_i32 = arith.constant 0 : i32
    %c0_i32_0 = arith.constant 0 : i32
    return %arg0, %c0_i32 : i32, i32
  }
}

</mosaic_0001>

<bundles_post_ra>
// kernel: tpu_custom_call.1
= control target key start
LH: loop header
LB: loop body
LE: loop exit
PB: predicated region body
PF: predicated region fallthrough
CT: control target
= control target key end

     0   :  { %7 = vsyncpa [#allocation3], 0  ;;  %s257_s0 = inlined_call_operand.hbm [shape: f32[16,128], index: 0, kind: input, shape index: {}]   ;;  %s258_s1 = inlined_call_operand.hbm [shape: f32[16,128], index: 1, kind: input, shape index: {}]   ;;  %s259_s2 = inlined_call_operand.hbm [shape: f32[16,128], index: 2, kind: output, shape index: {}]  }
   0x1   :  { %8 = vsyncpa [#allocation6], 0 }
   0x2   :  { %9 = vsyncpa [#allocation4], 0  ;;  %s192_s9 = smov [#allocation2]   ;;  %s120_s13 = scalar_lea.hbm %s257_s0, 256 }
   0x3   :  { %s19_s10 = sshll.u32 %s192_s9, 4  ;;  %p121_p0 = scmp.ne.s32.totalorder %s257_s0, %s120_s13  ;;  %s20_s10 = int_to_ptr.vmem [resolvable:$true] %s19_s10 }
   0x4   :  { %p124_p1 = scmp.lt.u32.totalorder %s120_s13, %s257_s0 }
   0x6   :  { %p126_p2 = pnand %p124_p1, %p121_p0 }
   0x8   :  { %129 = shalt.err (!%p126_p2)
}
   0x9   :  { %s130_s18 = scalar_lea.vmem %s20_s10, 256  ;;  %p135_p4 = scmp.lt.s32.totalorder %s20_s10, %s20_s10 }
   0xa   :  { %p131_p3 = scmp.ne.s32.totalorder %s20_s10, %s130_s18  ;;  %p136_p5 = scmp.lt.s32.totalorder %s130_s18, %s130_s18 }
   0xc   :  { %p137_p6 = por %p136_p5, %p135_p4 }
   0xe   :  { %p138_p7 = pnand %p137_p6, %p131_p3 }
  0x10   :  { %141 = shalt.err (!%p138_p7)
}
  0x11   :  { %s193_s19 = smov 128   ;;  %s194_s20 = smov 8  }
  0x12   :  { %25 = dma.hbm_to_vmem [thread:$0]  %s257_s0, 256, %s20_s10, [#allocation3], %s193_s19, %s193_s19, %s194_s20  }
  0x13   :  { %s195_s23 = smov [#allocation5]   ;;  %s142_s27 = scalar_lea.hbm %s258_s1, 256 }
  0x14   :  { %s35_s24 = sshll.u32 %s195_s23, 4  ;;  %p143_p8 = scmp.ne.s32.totalorder %s258_s1, %s142_s27  ;;  %s36_s24 = int_to_ptr.vmem [resolvable:$true] %s35_s24 }
  0x15   :  { %p146_p9 = scmp.lt.u32.totalorder %s142_s27, %s258_s1 }
  0x17   :  { %p148_p10 = pnand %p146_p9, %p143_p8 }
  0x19   :  { %151 = shalt.err (!%p148_p10)
}
  0x1a   :  { %s152_s4 = scalar_lea.vmem %s36_s24, 256  ;;  %p157_p12 = scmp.lt.s32.totalorder %s36_s24, %s36_s24 }
  0x1b   :  { %p153_p11 = scmp.ne.s32.totalorder %s36_s24, %s152_s4  ;;  %p158_p13 = scmp.lt.s32.totalorder %s152_s4, %s152_s4 }
  0x1d   :  { %p159_p0 = por %p158_p13, %p157_p12 }
  0x1f   :  { %p160_p1 = pnand %p159_p0, %p153_p11 }
  0x21   :  { %163 = shalt.err (!%p160_p1)
}
  0x22   :  { %41 = dma.hbm_to_vmem [thread:$0]  %s258_s1, 256, %s36_s24, [#allocation6], %s193_s19, %s193_s19, %s194_s20  }
  0x23   :  { %186 = dma.done.wait [#allocation3], 256  }
  0x24   :  { %187 = vsyncadd [#allocation3], 4294967040 }
  0x25   :  { %188 = dma.done.wait [#allocation6], 256  }
  0x26   :  { %189 = vsyncadd [#allocation6], 4294967040  ;;  %v58_v0 = vld [vmem:[#allocation2] sm:$0xff]  ;;  %v59_v1 = vld [vmem:[#allocation2 + $0x8] sm:$0xff]  ;;  %s196_s1 = smov [#allocation7]  }
  0x27   :  { %v104_v2 = vmul.f32 -1.442695, %v58_v0  ;;  %v105_v3 = vmul.f32 -1.442695, %v59_v1  ;;  %v60_v8 = vld [vmem:[#allocation5] sm:$0xff]  ;;  %v61_v9 = vld [vmem:[#allocation5 + $0x8] sm:$0xff] }
  0x28   :  { %s91_s6 = sshll.u32 %s196_s1, 4  ;;  %s92_s6 = int_to_ptr.vmem [resolvable:$true] %s91_s6 }
  0x29   :  { %112 = vpow2.f32 %v104_v2  ;;  %s164_s7 = scalar_lea.vmem %s92_s6, 256  ;;  %p169_p3 = scmp.lt.s32.totalorder %s92_s6, %s92_s6 }
  0x2a   :  { %114 = vpow2.f32 %v105_v3  ;;  %p165_p2 = scmp.ne.s32.totalorder %s92_s6, %s164_s7  ;;  %p170_p4 = scmp.lt.s32.totalorder %s164_s7, %s164_s7 }
  0x2c   :  { %p171_p5 = por %p170_p4, %p169_p3 }
  0x2e   :  { %p172_p6 = pnand %p171_p5, %p165_p2 }
  0x33   :  { %v113_v4 = vpop.eup %112 }
  0x34   :  { %v115_v5 = vpop.eup %114  ;;  %v68_v6 = vadd.f32 1.0, %v113_v4 }
  0x35   :  { %v69_v7 = vadd.f32 1.0, %v115_v5 }
  0x36   :  { %116 = vrcp.f32 %v68_v6 }
  0x37   :  { %118 = vrcp.f32 %v69_v7 }
  0x40   :  { %v117_v10 = vpop.eup %116 }
  0x41   :  { %v119_v11 = vpop.eup %118  ;;  %v74_v12 = vsub.f32 %v117_v10, %v60_v8 }
  0x42   :  { %v75_v13 = vsub.f32 %v119_v11, %v61_v9 }
  0x43   :  { %v76_v14 = vmul.f32 %v74_v12, %v74_v12 }
  0x44   :  { %v77_v15 = vmul.f32 %v75_v13, %v75_v13 }
  0x45   :  { %84 = vst [vmem:[#allocation7] sm:$0xff] %v76_v14 }
  0x46   :  { %85 = vst [vmem:[#allocation7 + $0x8] sm:$0xff] %v77_v15 }
  0x47   :  { %175 = shalt.err (!%p172_p6)
}
  0x48   :  { %s176_s10 = scalar_lea.hbm %s259_s2, 256 }
  0x49   :  { %p177_p7 = scmp.ne.s32.totalorder %s259_s2, %s176_s10  ;;  %p180_p8 = scmp.lt.u32.totalorder %s176_s10, %s259_s2 }
  0x4b   :  { %p182_p9 = pnand %p180_p8, %p177_p7 }
  0x4d   :  { %185 = shalt.err (!%p182_p9)
}
  0x4e   :  { %97 = dma.vmem_to_hbm [thread:$0]  %s92_s6, 256, %s259_s2, [#allocation4], %s193_s19, %s193_s19, %s194_s20  }
  0x4f   :  { %190 = dma.done.wait [#allocation4], 256  }
  0x50   :  { %191 = vsyncadd [#allocation4], 4294967040 }
  0x51   :  { %101 = vsyncpa [#allocation3], 1 }
  0x52   :  { %102 = vsyncpa [#allocation6], 1 }
  0x53   :  { %103 = vsyncpa [#allocation4], 1 }

</bundles_post_ra>
